<compile_context>
chip_gen: v7x
topology: tpu7x:2x2x1
jax: 0.10.0
libtpu: 0.0.40
codegen_flags: <defaults>
</compile_context>

<pallas_src>
import math
from functools import partial

import jax
import jax.numpy as jnp
from jax import lax
from jax.experimental import pallas as pl
from jax.experimental.pallas import tpu as pltpu


# ----------------------------- Pallas kernel ---------------------------------

def mha_kernel(x_ref, wqkv_ref, wcp_ref, bqkv_ref, bcp_ref, out_ref,
               *, n_head, n_embed, seq_len, block_b):
    H, E, T, Bblk = n_head, n_embed, seq_len, block_b
    HE = H * E
    M = Bblk * T          # rows handled this grid step (batch*seq on MXU M dim)
    G = H * Bblk          # combined (head, batch) dim for the attention matmuls

    # ---- fused QKV projection: one matmul with N = 3*H*E (fills MXU lanes) ---
    x = x_ref[...].astype(jnp.bfloat16)                                  # (M, E)
    qkv = jnp.dot(x, wqkv_ref[...],
                  preferred_element_type=jnp.float32) + bqkv_ref[...]    # (M, 3HE) f32
    # NOTE: 1/sqrt(n_embed) is already folded into the Q columns of wqkv/bqkv.

    # ---- split heads: static lane slices + leading-axis concat only ----------
    # (no transposes, no per-head matmuls)  -> (G, T, E) bf16, g = h*Bblk + b
    def split(base):
        cols = [qkv[:, base + h * E: base + (h + 1) * E].reshape(Bblk, T, E)
                for h in range(H)]
        return jnp.concatenate(cols, axis=0).astype(jnp.bfloat16)

    q = split(0)
    k = split(HE)
    v = split(2 * HE)

    # ---- scores (scale pre-folded into q): (G, T, T) f32 ---------------------
    s = jnp.einsum('gqd,gkd->gqk', q, k, preferred_element_type=jnp.float32)

    # causal mask: large finite negative (robust even for fully-masked rows)
    row = lax.broadcasted_iota(jnp.int32, (T, T), 0)
    col = lax.broadcasted_iota(jnp.int32, (T, T), 1)
    s = jnp.where((col <= row)[None], s, -1e30)
    # attention-score dropout in the reference has p = 0.0 -> exact identity.

    # ---- numerically-stable softmax in f32; EUP approx reciprocal ------------
    s = s - jnp.max(s, axis=-1, keepdims=True)
    p = jnp.exp(s)
    p = (p * pl.reciprocal(jnp.sum(p, axis=-1, keepdims=True), approx=True)
         ).astype(jnp.bfloat16)

    # ---- per-head context: (G, T, E) ------------------------------------------
    pv = jnp.einsum('gqk,gkd->gqd', p, v, preferred_element_type=jnp.float32)

    # ---- c_proj: concat heads along lanes, ONE contraction over K = H*E ------
    pv = pv.reshape(H, M, E).astype(jnp.bfloat16)          # leading split only
    cat = jnp.concatenate([pv[h] for h in range(H)], axis=-1)          # (M, HE)
    o = jnp.dot(cat, wcp_ref[...],
                preferred_element_type=jnp.float32) + bcp_ref[...]     # (M, E)

    out_ref[...] = o.astype(out_ref.dtype)


# ----------------------------- pallas_call wrapper ----------------------------

def _pick_block_b(B, T, E, H, budget_bytes=8 << 20):
    """Largest block_b giving >=2 grid steps whose working set fits the budget."""
    def step_bytes(bb):
        M, G = bb * T, H * bb
        return (M * 3 * H * E * 4        # qkv f32
                + 3 * G * T * E * 2      # q, k, v bf16
                + 2 * G * T * T * 4      # scores + probs f32
                + G * T * E * 4          # pv f32
                + M * H * E * 2          # concatenated heads bf16
                + 4 * M * E * 4)         # x / out blocks (double-buffered)
    bb = max(1, B // 2)                  # >= 2 grid steps (v7x megacore, overlap)
    while B % bb:
        bb -= 1
    while bb > 1 and step_bytes(bb) > budget_bytes:
        bb = max(1, bb // 2)
        while B % bb:
            bb -= 1
    return bb


def multi_head_attention(x, params, *, n_embed, n_head, block_b=None):
    B, T, E = x.shape
    H = n_head
    assert E == n_embed
    if block_b is None:
        block_b = _pick_block_b(B, T, E, H)
    assert B % block_b == 0, "batch must be divisible by block_b"
    grid = (B // block_b,)

    # --- build fused operands from the natural per-head params (outside kernel)
    scale = 1.0 / math.sqrt(n_embed)

    def flat(w):  # (H, E_in, E_out) -> (E_in, H*E_out), head h at cols h*E
        return jnp.transpose(w, (1, 0, 2)).reshape(E, H * E)

    w_qkv = jnp.concatenate(
        [flat(params["wq"]) * scale, flat(params["wk"]), flat(params["wv"])],
        axis=-1).astype(jnp.bfloat16)                                # (E, 3*H*E)
    b_qkv = jnp.concatenate(
        [params["bq"].reshape(1, H * E) * scale,
         params["bk"].reshape(1, H * E),
         params["bv"].reshape(1, H * E)], axis=-1).astype(jnp.float32)  # (1, 3HE)
    w_cp = params["wcp"].astype(jnp.bfloat16)                        # (H*E, E)
    b_cp = params["bcp"].reshape(1, E).astype(jnp.float32)           # (1, E)

    x2d = x.reshape(B * T, E)
    rows = block_b * T
    act_spec = pl.BlockSpec((rows, E), lambda b: (b, 0))

    kern = partial(mha_kernel, n_head=H, n_embed=E, seq_len=T, block_b=block_b)

    def run(resident_spec):
        return pl.pallas_call(
            kern,
            out_shape=jax.ShapeDtypeStruct((B * T, E), x.dtype),
            grid=grid,
            in_specs=[act_spec] + [resident_spec(a)
                                   for a in (w_qkv, w_cp, b_qkv, b_cp)],
            out_specs=act_spec,
            compiler_params=pltpu.CompilerParams(
                dimension_semantics=("parallel",),      # shard batch over TCs
                vmem_limit_bytes=32 * 1024 * 1024),
        )(x2d, w_qkv, w_cp, b_qkv, b_cp)

    def single_buf(a):  # constant-index residents: no need to double-buffer
        idx = (0,) * a.ndim
        return pl.BlockSpec(a.shape, lambda b, _i=idx: _i,
                            pipeline_mode=pl.Buffered(1))

    def double_buf(a):
        idx = (0,) * a.ndim
        return pl.BlockSpec(a.shape, lambda b, _i=idx: _i)

    try:
        out2d = run(single_buf)
    except Exception:
        # pipeline_mode / Buffered(1) unsupported in this jax build:
        # fall back to default double-buffered resident weights (correct, +VMEM).
        out2d = run(double_buf)

    return out2d.reshape(B, T, E)


# ----------------------------- params + reference -----------------------------

def init_params(key, *, n_embed, n_head):
    """Natural per-head params (f32). Weights stored (in, out) so y = x @ W + b.
    wcp rows h*E:(h+1)*E multiply head h's slice of the concatenated output."""
    H, E = n_head, n_embed
    ks = jax.random.split(key, 8)
    bnd_qkv = 1.0 / math.sqrt(E)           # torch nn.Linear default init range
    bnd_cp = 1.0 / math.sqrt(H * E)

    def unif(k, shape, b):
        return jax.random.uniform(k, shape, jnp.float32, -b, b)

    return {
        "wq": unif(ks[0], (H, E, E), bnd_qkv),
        "wk": unif(ks[1], (H, E, E), bnd_qkv),
        "wv": unif(ks[2], (H, E, E), bnd_qkv),
        "bq": unif(ks[3], (H, E), bnd_qkv),
        "bk": unif(ks[4], (H, E), bnd_qkv),
        "bv": unif(ks[5], (H, E), bnd_qkv),
        "wcp": unif(ks[6], (H * E, E), bnd_cp),
        "bcp": unif(ks[7], (E,), bnd_cp),
    }


def mha_reference(x, params, *, n_embed):
    """Pure-JAX f32 reference matching the PyTorch module semantics."""
    xf = x.astype(jnp.float32)
    q = jnp.einsum('bte,hef->bhtf', xf, params["wq"]) + params["bq"][None, :, None, :]
    k = jnp.einsum('bte,hef->bhtf', xf, params["wk"]) + params["bk"][None, :, None, :]
    v = jnp.einsum('bte,hef->bhtf', xf, params["wv"]) + params["bv"][None, :, None, :]
    s = jnp.einsum('bhtd,bhsd->bhts', q, k) / math.sqrt(n_embed)
    B, T = x.shape[0], x.shape[1]
    mask = jnp.tril(jnp.ones((T, T), bool))
    s = jnp.where(mask, s, -jnp.inf)
    p = jax.nn.softmax(s, axis=-1)
    pv = jnp.einsum('bhts,bhsd->bhtd', p, v)
    H = params["wq"].shape[0]
    cat = jnp.transpose(pv, (0, 2, 1, 3)).reshape(B, T, H * n_embed)
    out = cat @ params["wcp"] + params["bcp"]
    return out.astype(x.dtype)


# ----------------------------- main -------------------------------------------

if __name__ == "__main__":
    # small config consistent with the module (block_size >= seq_len)
    batch, seq_len = 2, 8
    n_embed, n_head = 32, 2          # dropout = 0.0 -> identity

    key = jax.random.PRNGKey(0)
    pkey, xkey = jax.random.split(key)
    params = init_params(pkey, n_embed=n_embed, n_head=n_head)
    x = jax.random.normal(xkey, (batch, seq_len, n_embed), dtype=jnp.float32)

    out = multi_head_attention(x, params, n_embed=n_embed, n_head=n_head)
    out = jax.block_until_ready(out)

    assert out.shape == (batch, seq_len, n_embed)
    assert bool(jnp.all(jnp.isfinite(out)))

    ref = mha_reference(x, params, n_embed=n_embed)
    max_err = float(jnp.max(jnp.abs(out - ref)))
    assert max_err < 5e-2, f"max abs error vs reference: {max_err}"

    print("KERNEL_OK")
</pallas_src>

<mosaic_0001>
module attributes {stable_mosaic.version = 11 : i64} {
  func.func @mha_kernel(%arg0: i32, %arg1: memref<8x32xf32, #tpu.memory_space<vmem>>, %arg2: memref<32x192xbf16, #tpu.memory_space<vmem>>, %arg3: memref<64x32xbf16, #tpu.memory_space<vmem>>, %arg4: memref<1x192xf32, #tpu.memory_space<vmem>>, %arg5: memref<1x32xf32, #tpu.memory_space<vmem>>, %arg6: memref<8x32xf32, #tpu.memory_space<vmem>>) attributes {dimension_semantics = [#tpu.dimension_semantics<parallel>], iteration_bounds = array<i64: 2>, scalar_prefetch = 0 : i64, scratch_operands = 0 : i64, tpu.core_type = #tpu.core_type<tc>, window_params = [{transform_indices = @transform_0, window_bounds = array<i64: 8, 32>}, {pipeline_mode = #tpu.pipeline_mode<synchronous>, transform_indices = @transform_1, window_bounds = array<i64: 32, 192>}, {pipeline_mode = #tpu.pipeline_mode<synchronous>, transform_indices = @transform_2, window_bounds = array<i64: 64, 32>}, {pipeline_mode = #tpu.pipeline_mode<synchronous>, transform_indices = @transform_3, window_bounds = array<i64: 1, 192>}, {pipeline_mode = #tpu.pipeline_mode<synchronous>, transform_indices = @transform_4, window_bounds = array<i64: 1, 32>}, {transform_indices = @transform_5, window_bounds = array<i64: 8, 32>}]} {
    %c0 = arith.constant 0 : index
    %c0_0 = arith.constant 0 : index
    %0 = vector.load %arg1[%c0, %c0_0] : memref<8x32xf32, #tpu.memory_space<vmem>>, vector<8x32xf32>
    %1 = arith.truncf %0 : vector<8x32xf32> to vector<8x32xbf16>
    %c0_1 = arith.constant 0 : index
    %c0_2 = arith.constant 0 : index
    %2 = vector.load %arg2[%c0_1, %c0_2] : memref<32x192xbf16, #tpu.memory_space<vmem>>, vector<32x192xbf16>
    %cst = arith.constant dense<0.000000e+00> : vector<8x192xf32>
    %3 = tpu.matmul %1, %2, %cst {dimension_numbers = #tpu.dot_dimension_numbers<[1], [0], [0], [1], [0, 0, 1, 1], [], []>} : vector<8x32xbf16>, vector<32x192xbf16>, vector<8x192xf32> -> vector<8x192xf32>
    %c0_3 = arith.constant 0 : index
    %c0_4 = arith.constant 0 : index
    %4 = vector.load %arg4[%c0_3, %c0_4] : memref<1x192xf32, #tpu.memory_space<vmem>>, vector<1x192xf32>
    %5 = vector.broadcast %4 : vector<1x192xf32> to vector<8x192xf32>
    %6 = arith.addf %3, %5 : vector<8x192xf32>
    %7 = vector.extract_strided_slice %6 {offsets = [0, 0], sizes = [8, 32], strides = [1, 1]} : vector<8x192xf32> to vector<8x32xf32>
    %8 = vector.shape_cast %7 : vector<8x32xf32> to vector<1x8x32xf32>
    %9 = vector.extract_strided_slice %6 {offsets = [0, 32], sizes = [8, 32], strides = [1, 1]} : vector<8x192xf32> to vector<8x32xf32>
    %10 = vector.shape_cast %9 : vector<8x32xf32> to vector<1x8x32xf32>
    %11 = tpu.concatenate %8, %10 in 0 : vector<1x8x32xf32>, vector<1x8x32xf32> -> vector<2x8x32xf32>
    %12 = arith.truncf %11 : vector<2x8x32xf32> to vector<2x8x32xbf16>
    %13 = vector.extract_strided_slice %6 {offsets = [0, 64], sizes = [8, 32], strides = [1, 1]} : vector<8x192xf32> to vector<8x32xf32>
    %14 = vector.shape_cast %13 : vector<8x32xf32> to vector<1x8x32xf32>
    %15 = vector.extract_strided_slice %6 {offsets = [0, 96], sizes = [8, 32], strides = [1, 1]} : vector<8x192xf32> to vector<8x32xf32>
    %16 = vector.shape_cast %15 : vector<8x32xf32> to vector<1x8x32xf32>
    %17 = tpu.concatenate %14, %16 in 0 : vector<1x8x32xf32>, vector<1x8x32xf32> -> vector<2x8x32xf32>
    %18 = arith.truncf %17 : vector<2x8x32xf32> to vector<2x8x32xbf16>
    %19 = vector.extract_strided_slice %6 {offsets = [0, 128], sizes = [8, 32], strides = [1, 1]} : vector<8x192xf32> to vector<8x32xf32>
    %20 = vector.shape_cast %19 : vector<8x32xf32> to vector<1x8x32xf32>
    %21 = vector.extract_strided_slice %6 {offsets = [0, 160], sizes = [8, 32], strides = [1, 1]} : vector<8x192xf32> to vector<8x32xf32>
    %22 = vector.shape_cast %21 : vector<8x32xf32> to vector<1x8x32xf32>
    %23 = tpu.concatenate %20, %22 in 0 : vector<1x8x32xf32>, vector<1x8x32xf32> -> vector<2x8x32xf32>
    %24 = arith.truncf %23 : vector<2x8x32xf32> to vector<2x8x32xbf16>
    "tpu.trace_start"() <{level = 10 : i32, message = "gqd,gkd->gqk"}> : () -> ()
    %cst_5 = arith.constant dense<0.000000e+00> : vector<2x8x8xf32>
    %25 = tpu.matmul %12, %18, %cst_5 {dimension_numbers = #tpu.dot_dimension_numbers<[2], [2], [1], [1], [0, 0, 0, 1, 1, 1], [0], [0]>} : vector<2x8x32xbf16>, vector<2x8x32xbf16>, vector<2x8x8xf32> -> vector<2x8x8xf32>
    "tpu.trace_stop"() : () -> ()
    %26 = tpu.iota {dimensions = array<i32: 0>} : vector<8x8xi32>
    %27 = tpu.iota {dimensions = array<i32: 1>} : vector<8x8xi32>
    %28 = arith.cmpi sle, %27, %26 : vector<8x8xi32>
    %29 = vector.shape_cast %28 : vector<8x8xi1> to vector<1x8x8xi1>
    %cst_6 = arith.constant -1.000000e+30 : f32
    %30 = vector.shape_cast %29 : vector<1x8x8xi1> to vector<1x8x8xi1>
    %31 = vector.broadcast %30 : vector<1x8x8xi1> to vector<2x8x8xi1>
    %32 = vector.broadcast %cst_6 : f32 to vector<2x8x8xf32>
    %33 = arith.select %31, %25, %32 : vector<2x8x8xi1>, vector<2x8x8xf32>
    %cst_7 = arith.constant dense<0xFF800000> : vector<2x8xf32>
    %34 = vector.multi_reduction <maximumf>, %33, %cst_7 [2] : vector<2x8x8xf32> to vector<2x8xf32>
    %35 = vector.shape_cast %34 : vector<2x8xf32> to vector<2x8x1xf32>
    %36 = vector.broadcast %35 : vector<2x8x1xf32> to vector<2x8x8xf32>
    %37 = arith.subf %33, %36 : vector<2x8x8xf32>
    %38 = math.exp %37 : vector<2x8x8xf32>
    %cst_8 = arith.constant dense<0.000000e+00> : vector<2x8xf32>
    %39 = vector.multi_reduction <add>, %38, %cst_8 [2] : vector<2x8x8xf32> to vector<2x8xf32>
    %40 = vector.shape_cast %39 : vector<2x8xf32> to vector<2x8x1xf32>
    %41 = tpu.reciprocal %40 {approx = true} : vector<2x8x1xf32> -> vector<2x8x1xf32>
    %42 = vector.broadcast %41 : vector<2x8x1xf32> to vector<2x8x8xf32>
    %43 = arith.mulf %38, %42 : vector<2x8x8xf32>
    %44 = arith.truncf %43 : vector<2x8x8xf32> to vector<2x8x8xbf16>
    "tpu.trace_start"() <{level = 10 : i32, message = "gqk,gkd->gqd"}> : () -> ()
    %cst_9 = arith.constant dense<0.000000e+00> : vector<2x8x32xf32>
    %45 = tpu.matmul %44, %24, %cst_9 {dimension_numbers = #tpu.dot_dimension_numbers<[2], [1], [1], [2], [0, 0, 0, 1, 1, 2], [0], [0]>} : vector<2x8x8xbf16>, vector<2x8x32xbf16>, vector<2x8x32xf32> -> vector<2x8x32xf32>
    "tpu.trace_stop"() : () -> ()
    %46 = arith.truncf %45 : vector<2x8x32xf32> to vector<2x8x32xbf16>
    %47 = vector.extract_strided_slice %46 {offsets = [0, 0, 0], sizes = [1, 8, 32], strides = [1, 1, 1]} : vector<2x8x32xbf16> to vector<1x8x32xbf16>
    %48 = vector.shape_cast %47 : vector<1x8x32xbf16> to vector<8x32xbf16>
    %49 = vector.extract_strided_slice %46 {offsets = [1, 0, 0], sizes = [1, 8, 32], strides = [1, 1, 1]} : vector<2x8x32xbf16> to vector<1x8x32xbf16>
    %50 = vector.shape_cast %49 : vector<1x8x32xbf16> to vector<8x32xbf16>
    %51 = tpu.concatenate %48, %50 in 1 : vector<8x32xbf16>, vector<8x32xbf16> -> vector<8x64xbf16>
    %c0_10 = arith.constant 0 : index
    %c0_11 = arith.constant 0 : index
    %52 = vector.load %arg3[%c0_10, %c0_11] : memref<64x32xbf16, #tpu.memory_space<vmem>>, vector<64x32xbf16>
    %cst_12 = arith.constant dense<0.000000e+00> : vector<8x32xf32>
    %53 = tpu.matmul %51, %52, %cst_12 {dimension_numbers = #tpu.dot_dimension_numbers<[1], [0], [0], [1], [0, 0, 1, 1], [], []>} : vector<8x64xbf16>, vector<64x32xbf16>, vector<8x32xf32> -> vector<8x32xf32>
    %c0_13 = arith.constant 0 : index
    %c0_14 = arith.constant 0 : index
    %54 = vector.load %arg5[%c0_13, %c0_14] : memref<1x32xf32, #tpu.memory_space<vmem>>, vector<1x32xf32>
    %55 = vector.broadcast %54 : vector<1x32xf32> to vector<8x32xf32>
    %56 = arith.addf %53, %55 : vector<8x32xf32>
    %c0_15 = arith.constant 0 : index
    %c0_16 = arith.constant 0 : index
    %57 = vector.load %arg6[%c0_15, %c0_16] : memref<8x32xf32, #tpu.memory_space<vmem>>, vector<8x32xf32>
    tpu.vector_store %arg6[%c0_15, %c0_16], %56 {strides = array<i32>} : memref<8x32xf32, #tpu.memory_space<vmem>>, vector<8x32xf32>,
    return
  }
  func.func @transform_0(%arg0: i32) -> (i32, i32) {
    %c0_i32 = arith.constant 0 : i32
    %c0_i32_0 = arith.constant 0 : i32
    return %arg0, %c0_i32 : i32, i32
  }
  func.func @transform_1(%arg0: i32) -> (i32, i32) {
    %c0_i32 = arith.constant 0 : i32
    %c0_i32_0 = arith.constant 0 : i32
    %c0_i32_1 = arith.constant 0 : i32
    return %c0_i32, %c0_i32_0 : i32, i32
  }
  func.func @transform_2(%arg0: i32) -> (i32, i32) {
    %c0_i32 = arith.constant 0 : i32
    %c0_i32_0 = arith.constant 0 : i32
    %c0_i32_1 = arith.constant 0 : i32
    return %c0_i32, %c0_i32_0 : i32, i32
  }
  func.func @transform_3(%arg0: i32) -> (i32, i32) {
    %c0_i32 = arith.constant 0 : i32
    %c0_i32_0 = arith.constant 0 : i32
    %c0_i32_1 = arith.constant 0 : i32
    return %c0_i32, %c0_i32_0 : i32, i32
  }
  func.func @transform_4(%arg0: i32) -> (i32, i32) {
    %c0_i32 = arith.constant 0 : i32
    %c0_i32_0 = arith.constant 0 : i32
    %c0_i32_1 = arith.constant 0 : i32
    return %c0_i32, %c0_i32_0 : i32, i32
  }
  func.func @transform_5(%arg0: i32) -> (i32, i32) {
    %c0_i32 = arith.constant 0 : i32
    %c0_i32_0 = arith.constant 0 : i32
    return %arg0, %c0_i32 : i32, i32
  }
}

module attributes {stable_mosaic.version = 11 : i64} {
  func.func @mha_kernel(%arg0: i32, %arg1: memref<8x32xf32, #tpu.memory_space<vmem>>, %arg2: memref<32x192xbf16, #tpu.memory_space<vmem>>, %arg3: memref<64x32xbf16, #tpu.memory_space<vmem>>, %arg4: memref<1x192xf32, #tpu.memory_space<vmem>>, %arg5: memref<1x32xf32, #tpu.memory_space<vmem>>, %arg6: memref<8x32xf32, #tpu.memory_space<vmem>>) attributes {dimension_semantics = [#tpu.dimension_semantics<parallel>], iteration_bounds = array<i64: 2>, scalar_prefetch = 0 : i64, scratch_operands = 0 : i64, tpu.core_type = #tpu.core_type<tc>, window_params = [{transform_indices = @transform_0, window_bounds = array<i64: 8, 32>}, {pipeline_mode = #tpu.pipeline_mode<synchronous>, transform_indices = @transform_1, window_bounds = array<i64: 32, 192>}, {pipeline_mode = #tpu.pipeline_mode<synchronous>, transform_indices = @transform_2, window_bounds = array<i64: 64, 32>}, {pipeline_mode = #tpu.pipeline_mode<synchronous>, transform_indices = @transform_3, window_bounds = array<i64: 1, 192>}, {pipeline_mode = #tpu.pipeline_mode<synchronous>, transform_indices = @transform_4, window_bounds = array<i64: 1, 32>}, {transform_indices = @transform_5, window_bounds = array<i64: 8, 32>}]} {
    %c0 = arith.constant 0 : index
    %c0_0 = arith.constant 0 : index
    %0 = vector.load %arg1[%c0, %c0_0] : memref<8x32xf32, #tpu.memory_space<vmem>>, vector<8x32xf32>
    %1 = arith.truncf %0 : vector<8x32xf32> to vector<8x32xbf16>
    %c0_1 = arith.constant 0 : index
    %c0_2 = arith.constant 0 : index
    %2 = vector.load %arg2[%c0_1, %c0_2] : memref<32x192xbf16, #tpu.memory_space<vmem>>, vector<32x192xbf16>
    %cst = arith.constant dense<0.000000e+00> : vector<8x192xf32>
    %3 = tpu.matmul %1, %2, %cst {dimension_numbers = #tpu.dot_dimension_numbers<[1], [0], [0], [1], [0, 0, 1, 1], [], []>} : vector<8x32xbf16>, vector<32x192xbf16>, vector<8x192xf32> -> vector<8x192xf32>
    %c0_3 = arith.constant 0 : index
    %c0_4 = arith.constant 0 : index
    %4 = vector.load %arg4[%c0_3, %c0_4] : memref<1x192xf32, #tpu.memory_space<vmem>>, vector<1x192xf32>
    %5 = vector.broadcast %4 : vector<1x192xf32> to vector<8x192xf32>
    %6 = arith.addf %3, %5 : vector<8x192xf32>
    %7 = vector.extract_strided_slice %6 {offsets = [0, 0], sizes = [8, 32], strides = [1, 1]} : vector<8x192xf32> to vector<8x32xf32>
    %8 = vector.shape_cast %7 : vector<8x32xf32> to vector<1x8x32xf32>
    %9 = vector.extract_strided_slice %6 {offsets = [0, 32], sizes = [8, 32], strides = [1, 1]} : vector<8x192xf32> to vector<8x32xf32>
    %10 = vector.shape_cast %9 : vector<8x32xf32> to vector<1x8x32xf32>
    %11 = tpu.concatenate %8, %10 in 0 : vector<1x8x32xf32>, vector<1x8x32xf32> -> vector<2x8x32xf32>
    %12 = arith.truncf %11 : vector<2x8x32xf32> to vector<2x8x32xbf16>
    %13 = vector.extract_strided_slice %6 {offsets = [0, 64], sizes = [8, 32], strides = [1, 1]} : vector<8x192xf32> to vector<8x32xf32>
    %14 = vector.shape_cast %13 : vector<8x32xf32> to vector<1x8x32xf32>
    %15 = vector.extract_strided_slice %6 {offsets = [0, 96], sizes = [8, 32], strides = [1, 1]} : vector<8x192xf32> to vector<8x32xf32>
    %16 = vector.shape_cast %15 : vector<8x32xf32> to vector<1x8x32xf32>
    %17 = tpu.concatenate %14, %16 in 0 : vector<1x8x32xf32>, vector<1x8x32xf32> -> vector<2x8x32xf32>
    %18 = arith.truncf %17 : vector<2x8x32xf32> to vector<2x8x32xbf16>
    %19 = vector.extract_strided_slice %6 {offsets = [0, 128], sizes = [8, 32], strides = [1, 1]} : vector<8x192xf32> to vector<8x32xf32>
    %20 = vector.shape_cast %19 : vector<8x32xf32> to vector<1x8x32xf32>
    %21 = vector.extract_strided_slice %6 {offsets = [0, 160], sizes = [8, 32], strides = [1, 1]} : vector<8x192xf32> to vector<8x32xf32>
    %22 = vector.shape_cast %21 : vector<8x32xf32> to vector<1x8x32xf32>
    %23 = tpu.concatenate %20, %22 in 0 : vector<1x8x32xf32>, vector<1x8x32xf32> -> vector<2x8x32xf32>
    %24 = arith.truncf %23 : vector<2x8x32xf32> to vector<2x8x32xbf16>
    "tpu.trace_start"() <{level = 10 : i32, message = "gqd,gkd->gqk"}> : () -> ()
    %cst_5 = arith.constant dense<0.000000e+00> : vector<2x8x8xf32>
    %25 = tpu.matmul %12, %18, %cst_5 {dimension_numbers = #tpu.dot_dimension_numbers<[2], [2], [1], [1], [0, 0, 0, 1, 1, 1], [0], [0]>} : vector<2x8x32xbf16>, vector<2x8x32xbf16>, vector<2x8x8xf32> -> vector<2x8x8xf32>
    "tpu.trace_stop"() : () -> ()
    %26 = tpu.iota {dimensions = array<i32: 0>} : vector<8x8xi32>
    %27 = tpu.iota {dimensions = array<i32: 1>} : vector<8x8xi32>
    %28 = arith.cmpi sle, %27, %26 : vector<8x8xi32>
    %29 = vector.shape_cast %28 : vector<8x8xi1> to vector<1x8x8xi1>
    %cst_6 = arith.constant -1.000000e+30 : f32
    %30 = vector.shape_cast %29 : vector<1x8x8xi1> to vector<1x8x8xi1>
    %31 = vector.broadcast %30 : vector<1x8x8xi1> to vector<2x8x8xi1>
    %32 = vector.broadcast %cst_6 : f32 to vector<2x8x8xf32>
    %33 = arith.select %31, %25, %32 : vector<2x8x8xi1>, vector<2x8x8xf32>
    %cst_7 = arith.constant dense<0xFF800000> : vector<2x8xf32>
    %34 = vector.multi_reduction <maximumf>, %33, %cst_7 [2] : vector<2x8x8xf32> to vector<2x8xf32>
    %35 = vector.shape_cast %34 : vector<2x8xf32> to vector<2x8x1xf32>
    %36 = vector.broadcast %35 : vector<2x8x1xf32> to vector<2x8x8xf32>
    %37 = arith.subf %33, %36 : vector<2x8x8xf32>
    %38 = math.exp %37 : vector<2x8x8xf32>
    %cst_8 = arith.constant dense<0.000000e+00> : vector<2x8xf32>
    %39 = vector.multi_reduction <add>, %38, %cst_8 [2] : vector<2x8x8xf32> to vector<2x8xf32>
    %40 = vector.shape_cast %39 : vector<2x8xf32> to vector<2x8x1xf32>
    %41 = tpu.reciprocal %40 {approx = true} : vector<2x8x1xf32> -> vector<2x8x1xf32>
    %42 = vector.broadcast %41 : vector<2x8x1xf32> to vector<2x8x8xf32>
    %43 = arith.mulf %38, %42 : vector<2x8x8xf32>
    %44 = arith.truncf %43 : vector<2x8x8xf32> to vector<2x8x8xbf16>
    "tpu.trace_start"() <{level = 10 : i32, message = "gqk,gkd->gqd"}> : () -> ()
    %cst_9 = arith.constant dense<0.000000e+00> : vector<2x8x32xf32>
    %45 = tpu.matmul %44, %24, %cst_9 {dimension_numbers = #tpu.dot_dimension_numbers<[2], [1], [1], [2], [0, 0, 0, 1, 1, 2], [0], [0]>} : vector<2x8x8xbf16>, vector<2x8x32xbf16>, vector<2x8x32xf32> -> vector<2x8x32xf32>
    "tpu.trace_stop"() : () -> ()
    %46 = arith.truncf %45 : vector<2x8x32xf32> to vector<2x8x32xbf16>
    %47 = vector.extract_strided_slice %46 {offsets = [0, 0, 0], sizes = [1, 8, 32], strides = [1, 1, 1]} : vector<2x8x32xbf16> to vector<1x8x32xbf16>
    %48 = vector.shape_cast %47 : vector<1x8x32xbf16> to vector<8x32xbf16>
    %49 = vector.extract_strided_slice %46 {offsets = [1, 0, 0], sizes = [1, 8, 32], strides = [1, 1, 1]} : vector<2x8x32xbf16> to vector<1x8x32xbf16>
    %50 = vector.shape_cast %49 : vector<1x8x32xbf16> to vector<8x32xbf16>
    %51 = tpu.concatenate %48, %50 in 1 : vector<8x32xbf16>, vector<8x32xbf16> -> vector<8x64xbf16>
    %c0_10 = arith.constant 0 : index
    %c0_11 = arith.constant 0 : index
    %52 = vector.load %arg3[%c0_10, %c0_11] : memref<64x32xbf16, #tpu.memory_space<vmem>>, vector<64x32xbf16>
    %cst_12 = arith.constant dense<0.000000e+00> : vector<8x32xf32>
    %53 = tpu.matmul %51, %52, %cst_12 {dimension_numbers = #tpu.dot_dimension_numbers<[1], [0], [0], [1], [0, 0, 1, 1], [], []>} : vector<8x64xbf16>, vector<64x32xbf16>, vector<8x32xf32> -> vector<8x32xf32>
    %c0_13 = arith.constant 0 : index
    %c0_14 = arith.constant 0 : index
    %54 = vector.load %arg5[%c0_13, %c0_14] : memref<1x32xf32, #tpu.memory_space<vmem>>, vector<1x32xf32>
    %55 = vector.broadcast %54 : vector<1x32xf32> to vector<8x32xf32>
    %56 = arith.addf %53, %55 : vector<8x32xf32>
    %c0_15 = arith.constant 0 : index
    %c0_16 = arith.constant 0 : index
    %57 = vector.load %arg6[%c0_15, %c0_16] : memref<8x32xf32, #tpu.memory_space<vmem>>, vector<8x32xf32>
    tpu.vector_store %arg6[%c0_15, %c0_16], %56 {strides = array<i32>} : memref<8x32xf32, #tpu.memory_space<vmem>>, vector<8x32xf32>,
    return
  }
  func.func @transform_0(%arg0: i32) -> (i32, i32) {
    %c0_i32 = arith.constant 0 : i32
    %c0_i32_0 = arith.constant 0 : i32
    return %arg0, %c0_i32 : i32, i32
  }
  func.func @transform_1(%arg0: i32) -> (i32, i32) {
    %c0_i32 = arith.constant 0 : i32
    %c0_i32_0 = arith.constant 0 : i32
    %c0_i32_1 = arith.constant 0 : i32
    return %c0_i32, %c0_i32_0 : i32, i32
  }
  func.func @transform_2(%arg0: i32) -> (i32, i32) {
    %c0_i32 = arith.constant 0 : i32
    %c0_i32_0 = arith.constant 0 : i32
    %c0_i32_1 = arith.constant 0 : i32
    return %c0_i32, %c0_i32_0 : i32, i32
  }
  func.func @transform_3(%arg0: i32) -> (i32, i32) {
    %c0_i32 = arith.constant 0 : i32
    %c0_i32_0 = arith.constant 0 : i32
    %c0_i32_1 = arith.constant 0 : i32
    return %c0_i32, %c0_i32_0 : i32, i32
  }
  func.func @transform_4(%arg0: i32) -> (i32, i32) {
    %c0_i32 = arith.constant 0 : i32
    %c0_i32_0 = arith.constant 0 : i32
    %c0_i32_1 = arith.constant 0 : i32
    return %c0_i32, %c0_i32_0 : i32, i32
  }
  func.func @transform_5(%arg0: i32) -> (i32, i32) {
    %c0_i32 = arith.constant 0 : i32
    %c0_i32_0 = arith.constant 0 : i32
    return %arg0, %c0_i32 : i32, i32
  }
}

</mosaic_0001>

<bundles_post_ra>
// kernel: tpu_custom_call.1
= control target key start
LH: loop header
LB: loop body
LE: loop exit
PB: predicated region body
PF: predicated region fallthrough
CT: control target
= control target key end

     0   :  { %10 = vsyncpa [#allocation3], 0  ;;  %s1108_s0 = inlined_call_operand.vmem [shape: f32[16,32], index: 0, kind: input, shape index: {}]   ;;  %s1109_s1 = inlined_call_operand.vmem [shape: bf16[32,192], index: 1, kind: input, shape index: {}]   ;;  %s1110_s2 = inlined_call_operand.vmem [shape: bf16[64,32], index: 2, kind: input, shape index: {}]   ;;  %s1111_s3 = inlined_call_operand.vmem [shape: f32[1,192], index: 3, kind: input, shape index: {}]   ;;  %s1112_s4 = inlined_call_operand.vmem [shape: f32[1,32], index: 4, kind: input, shape index: {}]   ;;  %s1113_s5 = inlined_call_operand.hbm [shape: f32[16,32], index: 5, kind: output, shape index: {}]  }
   0x1   :  { %12 = vsyncpa [#allocation3 + $0x1], 0  ;;  %s943_s18 = smov 0   ;;  %s945_s19 = smov 0  }
   0x2   :  { %s947_s20 = smov 0   ;;  %s949_s21 = smov 0  }
   0x3 LB: > { %s964_s22 = sadd.s32 4294967295, %s904_s21   ;;  %s705_s23 = sadd.s32 4294967294, %s904_s21   ;;  %s904_s21 = sphi %s949_s21, %s1119_s21   ;;  %s900_s20 = sphi %s947_s20, %s1118_s20   ;;  %s896_s19 = sphi %s945_s19, %s1117_s19   ;;  %s892_s18 = sphi %s943_s18, %s1116_s18  }
   0x4   : > { %s968_s24 = sadd.s32 1, %s904_s21   ;;  %s135_s25 = sadd.s32 1, %s900_s20 }
   0x5   : > { %s132_s26 = ssub.s32 %s904_s21, %s968_s24  ;;  %p145_p0 = scmp.ne.s32.totalorder %s900_s20, %s896_s19 }
   0x6   : > { %p133_p1 = scmp.eq.s32.totalorder %s132_s26, 0  ;;  %p146_p2 = scmp.eq.s32.totalorder %s964_s22, 1 }
   0x7   : > { %p151_p3 = scmp.ne.s32.totalorder %s896_s19, %s892_s18  ;;  %p152_p4 = scmp.eq.s32.totalorder %s705_s23, 1 }
   0x8   : > { %s979_s27 = scalar_select %p133_p1, %s900_s20, %s135_s25  }
   0x9   : > { %p981_p5 = por %p146_p2, %p145_p0  ;;  %p985_p6 = por %p152_p4, %p151_p3 }
   0xa   : > { %p708_p7 = scmp.ge.s32.totalorder %s904_s21, 1  ;;  %p189_p8 = scmp.lt.s32.totalorder %s904_s21, 3 }
   0xc   : > { %p190_p9 = pnand %p708_p7, %p189_p8 }
   0xd   : > { %v824_v0 = vld [vmem:[%s1109_s1 + $0x4] ss:$8 sps:$4 sm:$0xff] (!%p190_p9)   ;;  %p216_p10 = scmp.lt.s32.totalorder (!%p190_p9), %s964_s22, 1  ;;  %v826_v1 = vld [vmem:[%s1109_s1] ss:$8 sps:$4 sm:$0xff] (!%p190_p9)   ;;  %v906_v2 = vmov (!%p190_p9), 0   ;;  %v229_v7 = vlaneseq (!%p190_p9) }
   0xe   : > { %193 = sbr.rel (%p190_p9) target bundleno = 1569 (0x621), region = 40  ;;  %295 = vmatprep.mubr.bf16.mxu0 (!%p190_p9), %v906_v2  ;;  %263 = vmatprep.subr.bf16.mxu0 (!%p190_p9), %v824_v0  ;;  %v827_v3 = vld [vmem:[%s1109_s1 + $0x14] ss:$8 sps:$4 sm:$0xff] (!%p190_p9)   ;;  %v829_v4 = vld [vmem:[%s1109_s1 + $0x10] ss:$8 sps:$4 sm:$0xff] (!%p190_p9)   ;;  %vm259_vm0 = vcmask (!%p190_p9), 261120  }
   0xf   : > { %264 = vmatpush1.bf16.msra.mxu0 (!%p190_p9), %v826_v1  ;;  %v230_v8 = vshrl.u32 (!%p190_p9), %v229_v7, 7  ;;  %v907_v9 = vmov (!%p190_p9), 0.0   ;;  %v227_v11 = vld [vmem:[%s1111_s3] sm:$0x3] (!%p190_p9)  ;;  %vm908_vm1 = vmmov (!%p190_p9), 0   ;;  %s909_s26 = smov (!%p190_p9), 96  }
  0x10   : > { %265 = vmatprep.subr.bf16.mxu0 (!%p190_p9), %v827_v3  ;;  %743 = vmatprep.subr.bf16.mxu1 (!%p190_p9), %v907_v9  ;;  %s910_s30 = smov (!%p190_p9), 64   ;;  %vm451_vm2 = vcmask (!%p190_p9), 1043456   ;;  %v417_v30 = vand.u32 (!%p190_p9), 127, %v229_v7  ;;  %vm423_vm4 = vcmask (!%p190_p9), 64512   ;;  %v830_v0 = vld [vmem:[%s1110_s2] sm:$0xff] (!%p190_p9)   ;;  %v831_v1 = vld [vmem:[%s1110_s2 + $0x8] sm:$0xff] (!%p190_p9)  }
  0x11   : > { %v231_v10 = vsub.s32 (!%p190_p9), 0, %v230_v8  ;;  %745 = vmatprep.mubr.msk.bf16.mxu1 (!%p190_p9), %vm908_vm1, %v907_v9  ;;  %v235_v19 = vsub.s32 (!%p190_p9), 1, %v230_v8  ;;  %v832_v2 = vld [vmem:[%s1110_s2 + $0x10] sm:$0xff] (!%p190_p9)   ;;  %v833_v3 = vld [vmem:[%s1110_s2 + $0x18] sm:$0xff] (!%p190_p9)   ;;  %vm588_vm5 = vcmask (!%p190_p9), 523264   ;;  %s213_s15 = sand.u32 (!%p190_p9), 1, %s896_s19  }
  0x12   : > { %vm418_vm3 = vcmp.le.s32.totalorder (!%p190_p9), %v417_v30, %v230_v8  ;;  %s709_s16 = sshll.u32 (!%p190_p9), %s213_s15, 3  ;;  %s727_s25 = sshll.u32 (!%p190_p9), %s964_s22, 7 }
  0x13   : > { %266 = vmatpush1.bf16.msra.mxu0 (!%p190_p9), %v829_v4  ;;  %v232_v12 = vrot.slane (!%p190_p9), %v227_v11, %v231_v10  ;;  %v236_v20 = vrot.slane (!%p190_p9), %v227_v11, %v235_v19  ;;  %s1065_s8 = scalar_lea.hbm (!%p190_p9), %s1113_s5, %s727_s25  ;;  %s912_s10 = smov (!%p190_p9), [#allocation2]  }
  0x14   : > { %749 = vmatprep.subr.bf16.mxu0 (!%p190_p9), %v907_v9 }
  0x15   : > { %s217_s11 = scalar_select %p216_p10, %s964_s22, 1 }
  0x16   : > { %s633_s22 = scalar_lea.sflag [#allocation3], %s213_s15 }
  0x17   : > { %s710_s14 = sshll.u32 %s217_s11, 3  ;;  %s846_s11 = sshll.u32 %s912_s10, 4  ;;  %s847_s11 = int_to_ptr.vmem [resolvable:$false] %s846_s11 }
  0x18   : > { %s219_s17 = scalar_lea.vmem %s1108_s0, %s710_s14  ;;  %s911_s14 = smov 32  }
  0x19   : > { %v221_v5 = vld [vmem:[%s219_s17] sm:$0xff]  ;;  %s848_s12 = scalar_lea.vmem %s847_s11, 256 }
  0x1a   : > { %v222_v6 = vpack.c.bf16 %v221_v5, %v221_v5 }
  0x1c   : > { %715 = vmatmul.mubr.msk.bf16.vlgmr.msra.gmra.mrb[0].mxu0 %vm259_vm0, %v222_v6 }
  0x1d   : > { %751 = vmatprep.mubr.msk.bf16.mxu0 %vm908_vm1, %v907_v9 }
  0xef   : > { %v297_v13 = vpop.f32.mrb[0].mxu0 }
  0xf0   : > { %v298_v14 = vadd.f32 %v297_v13, %v232_v12  ;;  %v299_v15 = vpop.f32.mrb[1].mxu0 }
  0xf1   : > { %v301_v16 = vpop.f32.mrb[2].mxu0  ;;  %v300_v24 = vadd.f32 %v299_v15, %v236_v20 }
  0xf2   : > { %v302_v17 = vpop.f32.mrb[3].mxu0  ;;  %305 = vrot.lane.b32.xlu0 %v298_v14, %s909_s26  ;;  %v308_v18 = vpack.c.bf16 %v298_v14, %v298_v14 }
  0xf3   : > { %v314_v26 = vpack.c.bf16 %v300_v24, %v300_v24 }
  0xf4   : > { %317 = vrot.lane.b32.xlu1 %v308_v18, %s910_s30 }
  0xf5   : > { %v453_v27 = vsel %vm451_vm2, %v314_v26, 0 }
 0x164   : > { %v306_v21 = vpop.permute.xlu0 %305 }
 0x165   : > { %v309_v22 = vpack.c.bf16 %v306_v21, %v306_v21 }
 0x166   : > { %v318_v23 = vpop.permute.xlu1 %317 }
 0x167   : > { %366 = vrot.lane.b32.xlu0 %v309_v22, %s910_s30  ;;  %v323_v25 = vsel %vm259_vm0, %v318_v23, 0 }
 0x168   : > { %744 = vmatpush3.bf16.xpose.msra.mxu1 %v323_v25 }
 0x169   : > { %755 = vmatprep.subr.bf16.mxu1 %v907_v9 }
 0x16f   : > { %746 = vmatmul.mubr.msk.bf16.vlgmr.msra.gmra.mrb[0].mxu1 %vm259_vm0, %v308_v18 }
 0x170   : > { %756 = vmatpush3.bf16.msra.mxu1 %v453_v27  ;;  %757 = vmatprep.mubr.msk.bf16.mxu1 %vm908_vm1, %v907_v9 }
 0x171   : > { %767 = vmatprep.subr.bf16.mxu1 %v907_v9 }
 0x1d9   : > { %v367_v28 = vpop.permute.xlu0 %366 }
 0x1da   : > { %v372_v29 = vsel %vm259_vm0, %v367_v28, 0 }
 0x1db   : > { %750 = vmatpush3.bf16.xpose.msra.mxu0 %v372_v29 }
 0x1dc   : > { %761 = vmatprep.subr.bf16.mxu0 %v907_v9 }
 0x1e2   : > { %752 = vmatmul.mubr.msk.bf16.vlgmr.msra.gmra.mrb[4].mxu0 %vm259_vm0, %v309_v22 }
 0x1e3   : > { %763 = vmatprep.mubr.msk.bf16.mxu0 %vm908_vm1, %v907_v9 }
 0x242   : > { %v359_v31 = vpop.f32.mrb[0].mxu1 }
 0x243   : > { %v421_v32 = vsel %vm418_vm3, %v359_v31, -1e+30  ;;  %v747_v33 = vpop.f32.mrb[1].mxu1 }
 0x244   : > { %v362_v34 = vpop.f32.mrb[2].mxu1  ;;  %v424_v35 = vsel %vm423_vm4, %v421_v32, -inf }
 0x245   : > { %425 = vmax.xlane.f32.xlu0 %v424_v35  ;;  %v748_v36 = vpop.f32.mrb[3].mxu1 }
 0x2b5   : > { %v408_v37 = vpop.f32.mrb[4].mxu0 }
 0x2b6   : > { %v422_v38 = vsel %vm418_vm3, %v408_v37, -1e+30  ;;  %v753_v39 = vpop.f32.mrb[5].mxu0 }
 0x2b7   : > { %v411_v40 = vpop.f32.mrb[6].mxu0  ;;  %v427_v41 = vsel %vm423_vm4, %v422_v38, -inf }
 0x2b8   : > { %v754_v42 = vpop.f32.mrb[7].mxu0  ;;  %428 = vmax.xlane.f32.xlu1 %v427_v41 }
 0x2c9   : > { %311 = vrot.lane.b32.xlu1 %v300_v24, %s909_s26  ;;  %s215_s26 = scalar_lea.vmem [#allocation2], %s709_s16 }
 0x2ca   : > { %s646_s30 = sshll.u32 %s215_s26, 4  ;;  %s1067_s30 = int_to_ptr.vmem [resolvable:$true] %s646_s30 }
 0x2cb   : > { %s842_s9 = scalar_lea.vmem %s1067_s30, 128  ;;  %p849_p0 = scmp.lt.s32.totalorder %s1067_s30, %s847_s11 }
 0x2cc   : > { %p843_p11 = scmp.ne.s32.totalorder %s1067_s30, %s842_s9  ;;  %p850_p1 = scmp.lt.s32.totalorder %s848_s12, %s842_s9 }
 0x2ce   : > { %p844_p12 = pnand %p843_p11, %p981_p5  ;;  %p851_p2 = por %p850_p1, %p849_p0 }
 0x2d0   : > { %p845_p13 = pneg %p844_p12 }
 0x2d2   : > { %v426_v43 = vpop.xlane.xlu0 %425  ;;  %p852_p3 = pnand %p851_p2, %p845_p13 }
 0x2d3   : > { %v430_v44 = vsub.f32 %v421_v32, %v426_v43 }
 0x2d5   : > { %v432_v47 = vmul.f32 1.442695, %v430_v44 }
 0x345   : > { %v429_v45 = vpop.xlane.xlu1 %428 }
 0x346   : > { %v431_v46 = vsub.f32 %v422_v38, %v429_v45 }
 0x348   : > { %v434_v48 = vmul.f32 1.442695, %v431_v46 }
 0x349   : > { %v312_v49 = vpop.permute.xlu1 %311 }
 0x34a   : > { %834 = vpow2.f32 %v434_v48  ;;  %v315_v50 = vpack.c.bf16 %v312_v49, %v312_v49 }
 0x34b   : > { %836 = vpow2.f32 %v432_v47 }
 0x34c   : > { %v499_v51 = vsel %vm451_vm2, %v315_v50, 0 }
 0x34d   : > { %762 = vmatpush3.bf16.msra.mxu0 %v499_v51 }
 0x354   : > { %v835_v52 = vpop.eup %834 }
 0x355   : > { %v439_v53 = vsel %vm423_vm4, %v835_v52, 0.0  ;;  %v837_v54 = vpop.eup %836 }
 0x356   : > { %440 = vadd.xlane.f32.xlu0 %v439_v53  ;;  %v436_v55 = vsel %vm423_vm4, %v837_v54, 0.0 }
 0x35a   : > { %437 = vadd.xlane.f32.xlu0 %v436_v55 }
 0x3e3   : > { %v441_v56 = vpop.xlane.xlu0 %440 }
 0x3e4   : > { %838 = vrcp.f32 %v441_v56 }
 0x3e7   : > { %v438_v57 = vpop.xlane.xlu0 %437 }
 0x3e8   : > { %840 = vrcp.f32 %v438_v57 }
 0x3ee   : > { %v839_v58 = vpop.eup %838 }
 0x3ef   : > { %v445_v59 = vmul.f32 %v839_v58, %v835_v52 }
 0x3f1   : > { %v447_v60 = vpack.c.bf16 %v445_v59, %v445_v59 }
 0x3f2   : > { %v841_v61 = vpop.eup %840 }
 0x3f3   : > { %v444_v62 = vmul.f32 %v841_v61, %v837_v54  ;;  %764 = vmatmul.mubr.msk.bf16.vlgmr.msra.gmra.mrb[8].mxu0 %vm423_vm4, %v447_v60 }
 0x3f5   : > { %v446_v63 = vpack.c.bf16 %v444_v62, %v444_v62 }
 0x3f7   : > { %758 = vmatmul.mubr.msk.bf16.vlgmr.msra.gmra.mrb[4].mxu1 %vm423_vm4, %v446_v63 }
 0x3f8   : > { %775 = vmatprep.mubr.msk.bf16.mxu1 %vm908_vm1, %v907_v9  ;;  %768 = vmatpush3.bf16.msra.mxu1 %v830_v0 }
 0x3f9   : > { %769 = vmatprep.subr.bf16.mxu1 %v907_v9 }
 0x3fc   : > { %770 = vmatpush3.bf16.msra.mxu1 %v831_v1 }
 0x3fd   : > { %771 = vmatprep.subr.bf16.mxu1 %v907_v9 }
 0x400   : > { %772 = vmatpush3.bf16.msra.mxu1 %v832_v2 }
 0x401   : > { %773 = vmatprep.subr.bf16.mxu1 %v907_v9  ;;  %v720_v9 = vld [vmem:[%s1112_s4] ss:$0 sm:$0xff] }
 0x404   : > { %774 = vmatpush3.bf16.msra.mxu1 %v833_v3 }
 0x4c6   : > { %v535_v4 = vpop.f32.mrb[8].mxu0 }
 0x4c7   : > { %v542_v5 = vpack.c.bf16 %v535_v4, %v535_v4  ;;  %v765_v6 = vpop.f32.mrb[9].mxu0 }
 0x4c8   : > { %v538_v7 = vpop.f32.mrb[10].mxu0 }
 0x4c9   : > { %544 = vrot.lane.b32.xlu0 %v542_v5, %s911_s14  ;;  %v766_v8 = vpop.f32.mrb[11].mxu0 }
 0x4ca   : > { %v489_v10 = vpop.f32.mrb[4].mxu1 }
 0x4cb   : > { %v759_v11 = vpop.f32.mrb[5].mxu1  ;;  %v541_v14 = vpack.c.bf16 %v489_v10, %v489_v10 }
 0x4cc   : > { %v492_v12 = vpop.f32.mrb[6].mxu1 }
 0x4cd   : > { %v760_v13 = vpop.f32.mrb[7].mxu1 }
 0x53b   : > { %v545_v15 = vpop.permute.xlu0 %544 }
 0x53c   : > { %v548_v16 = vsel %vm259_vm0, %v541_v14, %v545_v15 }
 0x53d   : > { %776 = vmatmul.mubr.msk.bf16.vlgmr.msra.gmra.mrb[8].mxu1 %vm588_vm5, %v548_v16 }
 0x610   : > { %v625_v17 = vpop.f32.mrb[8].mxu1 }
 0x611   : > { %v626_v18 = vadd.f32 %v720_v9, %v625_v17  ;;  %v777_v19 = vpop.f32.mrb[9].mxu1 }
 0x612   : > { %v628_v20 = vpop.f32.mrb[10].mxu1 }
 0x613   : > { %v778_v21 = vpop.f32.mrb[11].mxu1  ;;  %631 = vst.msk [vmem:[%s215_s26] sm:$0xff] %vm259_vm0, %v626_v18 }
 0x614   : > { %855 = shalt.err (!%p852_p3)
}
 0x615   : > { %s856_s13 = scalar_lea.hbm %s1065_s8, 128  ;;  %s860_s16 = scalar_lea.hbm %s1113_s5, 256 }
 0x616   : > { %p857_p4 = scmp.ne.s32.totalorder %s1065_s8, %s856_s13  ;;  %p861_p9 = scmp.lt.u32.totalorder %s1065_s8, %s1113_s5 }
 0x617   : > { %p862_p10 = scmp.lt.u32.totalorder %s860_s16, %s856_s13  ;;  %p864_p12 = scmp.lt.u32.totalorder %s856_s13, %s1065_s8 }
 0x618   : > { %p858_p7 = pnand %p857_p4, %p981_p5 }
 0x619   : > { %p863_p11 = por %p862_p10, %p861_p9 }
 0x61a   : > { %p859_p8 = pneg %p858_p7 }
 0x61b   : > { %p865_p13 = por %p864_p12, %p863_p11 }
 0x61d   : > { %p866_p0 = pnand %p865_p13, %p859_p8 }
 0x61f   : > { %869 = shalt.err (!%p866_p0)
}
 0x620   : > { %779 = dma.vmem_to_hbm [thread:$0]  (%p981_p5), %s1067_s30, 128, %s1065_s8, %s633_s22  }
 0x621 PF: > { %p785_p1 = scmp.ge.s32.totalorder %s904_s21, 2  ;;  %s658_s25 = sand.u32 1, %s892_s18  }
 0x622   : > { %s659_s26 = scalar_lea.sflag [#allocation3], %s658_s25 }
 0x623   : > { %p782_p2 = pnand %p785_p1, %p985_p6 }
 0x625   : > { %887 = dma.done.wait (!%p782_p2), %s659_s26, 128  }
 0x626   : > { %889 = vsyncadd (!%p782_p2), %s659_s26, 4294967168  ;;  %p15_p3 = scmp.ge.s32.totalorder %s968_s24, 4   ;;  %s1116_s18 = smov %s896_s19 }
 0x627   : > { %s1117_s19 = smov %s900_s20  ;;  %s1118_s20 = smov %s979_s27 }
 0x628   : > { %s1119_s21 = smov %s968_s24  ;;  %17 = sbr.rel (!%p15_p3) target bundleno = 3 (0x3), region = 75 }
 0x62f   :  { %664 = vsyncpa [#allocation3], 1 }
 0x630   :  { %666 = vsyncpa [#allocation3 + $0x1], 1 }

// kernel: tpu_custom_call.1
= control target key start
LH: loop header
LB: loop body
LE: loop exit
PB: predicated region body
PF: predicated region fallthrough
CT: control target
= control target key end

     0   :  { %10 = vsyncpa [#allocation3], 0  ;;  %s1108_s0 = inlined_call_operand.vmem [shape: f32[16,32], index: 0, kind: input, shape index: {}]   ;;  %s1109_s1 = inlined_call_operand.vmem [shape: bf16[32,192], index: 1, kind: input, shape index: {}]   ;;  %s1110_s2 = inlined_call_operand.vmem [shape: bf16[64,32], index: 2, kind: input, shape index: {}]   ;;  %s1111_s3 = inlined_call_operand.vmem [shape: f32[1,192], index: 3, kind: input, shape index: {}]   ;;  %s1112_s4 = inlined_call_operand.vmem [shape: f32[1,32], index: 4, kind: input, shape index: {}]   ;;  %s1113_s5 = inlined_call_operand.hbm [shape: f32[16,32], index: 5, kind: output, shape index: {}]  }
   0x1   :  { %12 = vsyncpa [#allocation3 + $0x1], 0  ;;  %s943_s18 = smov 0   ;;  %s945_s19 = smov 0  }
   0x2   :  { %s947_s20 = smov 0   ;;  %s949_s21 = smov 0  }
   0x3 LB: > { %s964_s22 = sadd.s32 4294967295, %s904_s21   ;;  %s705_s23 = sadd.s32 4294967294, %s904_s21   ;;  %s904_s21 = sphi %s949_s21, %s1119_s21   ;;  %s900_s20 = sphi %s947_s20, %s1118_s20   ;;  %s896_s19 = sphi %s945_s19, %s1117_s19   ;;  %s892_s18 = sphi %s943_s18, %s1116_s18  }
   0x4   : > { %s968_s24 = sadd.s32 1, %s904_s21   ;;  %s135_s25 = sadd.s32 1, %s900_s20 }
   0x5   : > { %s132_s26 = ssub.s32 %s904_s21, %s968_s24  ;;  %p145_p0 = scmp.ne.s32.totalorder %s900_s20, %s896_s19 }
   0x6   : > { %p133_p1 = scmp.eq.s32.totalorder %s132_s26, 0  ;;  %p146_p2 = scmp.eq.s32.totalorder %s964_s22, 1 }
   0x7   : > { %p151_p3 = scmp.ne.s32.totalorder %s896_s19, %s892_s18  ;;  %p152_p4 = scmp.eq.s32.totalorder %s705_s23, 1 }
   0x8   : > { %s979_s27 = scalar_select %p133_p1, %s900_s20, %s135_s25  }
   0x9   : > { %p981_p5 = por %p146_p2, %p145_p0  ;;  %p985_p6 = por %p152_p4, %p151_p3 }
   0xa   : > { %p708_p7 = scmp.ge.s32.totalorder %s904_s21, 1  ;;  %p189_p8 = scmp.lt.s32.totalorder %s904_s21, 3 }
   0xc   : > { %p190_p9 = pnand %p708_p7, %p189_p8 }
   0xd   : > { %v824_v0 = vld [vmem:[%s1109_s1 + $0x4] ss:$8 sps:$4 sm:$0xff] (!%p190_p9)   ;;  %p216_p10 = scmp.lt.s32.totalorder (!%p190_p9), %s964_s22, 1  ;;  %v826_v1 = vld [vmem:[%s1109_s1] ss:$8 sps:$4 sm:$0xff] (!%p190_p9)   ;;  %v906_v2 = vmov (!%p190_p9), 0   ;;  %v229_v7 = vlaneseq (!%p190_p9) }
   0xe   : > { %193 = sbr.rel (%p190_p9) target bundleno = 1569 (0x621), region = 40  ;;  %295 = vmatprep.mubr.bf16.mxu0 (!%p190_p9), %v906_v2  ;;  %263 = vmatprep.subr.bf16.mxu0 (!%p190_p9), %v824_v0  ;;  %v827_v3 = vld [vmem:[%s1109_s1 + $0x14] ss:$8 sps:$4 sm:$0xff] (!%p190_p9)   ;;  %v829_v4 = vld [vmem:[%s1109_s1 + $0x10] ss:$8 sps:$4 sm:$0xff] (!%p190_p9)   ;;  %vm259_vm0 = vcmask (!%p190_p9), 261120  }
   0xf   : > { %264 = vmatpush1.bf16.msra.mxu0 (!%p190_p9), %v826_v1  ;;  %v230_v8 = vshrl.u32 (!%p190_p9), %v229_v7, 7  ;;  %v907_v9 = vmov (!%p190_p9), 0.0   ;;  %v227_v11 = vld [vmem:[%s1111_s3] sm:$0x3] (!%p190_p9)  ;;  %vm908_vm1 = vmmov (!%p190_p9), 0   ;;  %s909_s26 = smov (!%p190_p9), 96  }
  0x10   : > { %265 = vmatprep.subr.bf16.mxu0 (!%p190_p9), %v827_v3  ;;  %743 = vmatprep.subr.bf16.mxu1 (!%p190_p9), %v907_v9  ;;  %s910_s30 = smov (!%p190_p9), 64   ;;  %vm451_vm2 = vcmask (!%p190_p9), 1043456   ;;  %v417_v30 = vand.u32 (!%p190_p9), 127, %v229_v7  ;;  %vm423_vm4 = vcmask (!%p190_p9), 64512   ;;  %v830_v0 = vld [vmem:[%s1110_s2] sm:$0xff] (!%p190_p9)   ;;  %v831_v1 = vld [vmem:[%s1110_s2 + $0x8] sm:$0xff] (!%p190_p9)  }
  0x11   : > { %v231_v10 = vsub.s32 (!%p190_p9), 0, %v230_v8  ;;  %745 = vmatprep.mubr.msk.bf16.mxu1 (!%p190_p9), %vm908_vm1, %v907_v9  ;;  %v235_v19 = vsub.s32 (!%p190_p9), 1, %v230_v8  ;;  %v832_v2 = vld [vmem:[%s1110_s2 + $0x10] sm:$0xff] (!%p190_p9)   ;;  %v833_v3 = vld [vmem:[%s1110_s2 + $0x18] sm:$0xff] (!%p190_p9)   ;;  %vm588_vm5 = vcmask (!%p190_p9), 523264   ;;  %s213_s15 = sand.u32 (!%p190_p9), 1, %s896_s19  }
  0x12   : > { %vm418_vm3 = vcmp.le.s32.totalorder (!%p190_p9), %v417_v30, %v230_v8  ;;  %s709_s16 = sshll.u32 (!%p190_p9), %s213_s15, 3  ;;  %s727_s25 = sshll.u32 (!%p190_p9), %s964_s22, 7 }
  0x13   : > { %266 = vmatpush1.bf16.msra.mxu0 (!%p190_p9), %v829_v4  ;;  %v232_v12 = vrot.slane (!%p190_p9), %v227_v11, %v231_v10  ;;  %v236_v20 = vrot.slane (!%p190_p9), %v227_v11, %v235_v19  ;;  %s1065_s8 = scalar_lea.hbm (!%p190_p9), %s1113_s5, %s727_s25  ;;  %s912_s10 = smov (!%p190_p9), [#allocation2]  }
  0x14   : > { %749 = vmatprep.subr.bf16.mxu0 (!%p190_p9), %v907_v9 }
  0x15   : > { %s217_s11 = scalar_select %p216_p10, %s964_s22, 1 }
  0x16   : > { %s633_s22 = scalar_lea.sflag [#allocation3], %s213_s15 }
  0x17   : > { %s710_s14 = sshll.u32 %s217_s11, 3  ;;  %s846_s11 = sshll.u32 %s912_s10, 4  ;;  %s847_s11 = int_to_ptr.vmem [resolvable:$false] %s846_s11 }
  0x18   : > { %s219_s17 = scalar_lea.vmem %s1108_s0, %s710_s14  ;;  %s911_s14 = smov 32  }
  0x19   : > { %v221_v5 = vld [vmem:[%s219_s17] sm:$0xff]  ;;  %s848_s12 = scalar_lea.vmem %s847_s11, 256 }
  0x1a   : > { %v222_v6 = vpack.c.bf16 %v221_v5, %v221_v5 }
  0x1c   : > { %715 = vmatmul.mubr.msk.bf16.vlgmr.msra.gmra.mrb[0].mxu0 %vm259_vm0, %v222_v6 }
  0x1d   : > { %751 = vmatprep.mubr.msk.bf16.mxu0 %vm908_vm1, %v907_v9 }
  0xef   : > { %v297_v13 = vpop.f32.mrb[0].mxu0 }
  0xf0   : > { %v298_v14 = vadd.f32 %v297_v13, %v232_v12  ;;  %v299_v15 = vpop.f32.mrb[1].mxu0 }
  0xf1   : > { %v301_v16 = vpop.f32.mrb[2].mxu0  ;;  %v300_v24 = vadd.f32 %v299_v15, %v236_v20 }
  0xf2   : > { %v302_v17 = vpop.f32.mrb[3].mxu0  ;;  %305 = vrot.lane.b32.xlu0 %v298_v14, %s909_s26  ;;  %v308_v18 = vpack.c.bf16 %v298_v14, %v298_v14 }
  0xf3   : > { %v314_v26 = vpack.c.bf16 %v300_v24, %v300_v24 }
  0xf4   : > { %317 = vrot.lane.b32.xlu1 %v308_v18, %s910_s30 }
  0xf5   : > { %v453_v27 = vsel %vm451_vm2, %v314_v26, 0 }
 0x164   : > { %v306_v21 = vpop.permute.xlu0 %305 }
 0x165   : > { %v309_v22 = vpack.c.bf16 %v306_v21, %v306_v21 }
 0x166   : > { %v318_v23 = vpop.permute.xlu1 %317 }
 0x167   : > { %366 = vrot.lane.b32.xlu0 %v309_v22, %s910_s30  ;;  %v323_v25 = vsel %vm259_vm0, %v318_v23, 0 }
 0x168   : > { %744 = vmatpush3.bf16.xpose.msra.mxu1 %v323_v25 }
 0x169   : > { %755 = vmatprep.subr.bf16.mxu1 %v907_v9 }
 0x16f   : > { %746 = vmatmul.mubr.msk.bf16.vlgmr.msra.gmra.mrb[0].mxu1 %vm259_vm0, %v308_v18 }
 0x170   : > { %756 = vmatpush3.bf16.msra.mxu1 %v453_v27  ;;  %757 = vmatprep.mubr.msk.bf16.mxu1 %vm908_vm1, %v907_v9 }
 0x171   : > { %767 = vmatprep.subr.bf16.mxu1 %v907_v9 }
 0x1d9   : > { %v367_v28 = vpop.permute.xlu0 %366 }
 0x1da   : > { %v372_v29 = vsel %vm259_vm0, %v367_v28, 0 }
 0x1db   : > { %750 = vmatpush3.bf16.xpose.msra.mxu0 %v372_v29 }
 0x1dc   : > { %761 = vmatprep.subr.bf16.mxu0 %v907_v9 }
 0x1e2   : > { %752 = vmatmul.mubr.msk.bf16.vlgmr.msra.gmra.mrb[4].mxu0 %vm259_vm0, %v309_v22 }
 0x1e3   : > { %763 = vmatprep.mubr.msk.bf16.mxu0 %vm908_vm1, %v907_v9 }
 0x242   : > { %v359_v31 = vpop.f32.mrb[0].mxu1 }
 0x243   : > { %v421_v32 = vsel %vm418_vm3, %v359_v31, -1e+30  ;;  %v747_v33 = vpop.f32.mrb[1].mxu1 }
 0x244   : > { %v362_v34 = vpop.f32.mrb[2].mxu1  ;;  %v424_v35 = vsel %vm423_vm4, %v421_v32, -inf }
 0x245   : > { %425 = vmax.xlane.f32.xlu0 %v424_v35  ;;  %v748_v36 = vpop.f32.mrb[3].mxu1 }
 0x2b5   : > { %v408_v37 = vpop.f32.mrb[4].mxu0 }
 0x2b6   : > { %v422_v38 = vsel %vm418_vm3, %v408_v37, -1e+30  ;;  %v753_v39 = vpop.f32.mrb[5].mxu0 }
 0x2b7   : > { %v411_v40 = vpop.f32.mrb[6].mxu0  ;;  %v427_v41 = vsel %vm423_vm4, %v422_v38, -inf }
 0x2b8   : > { %v754_v42 = vpop.f32.mrb[7].mxu0  ;;  %428 = vmax.xlane.f32.xlu1 %v427_v41 }
 0x2c9   : > { %311 = vrot.lane.b32.xlu1 %v300_v24, %s909_s26  ;;  %s215_s26 = scalar_lea.vmem [#allocation2], %s709_s16 }
 0x2ca   : > { %s646_s30 = sshll.u32 %s215_s26, 4  ;;  %s1067_s30 = int_to_ptr.vmem [resolvable:$true] %s646_s30 }
 0x2cb   : > { %s842_s9 = scalar_lea.vmem %s1067_s30, 128  ;;  %p849_p0 = scmp.lt.s32.totalorder %s1067_s30, %s847_s11 }
 0x2cc   : > { %p843_p11 = scmp.ne.s32.totalorder %s1067_s30, %s842_s9  ;;  %p850_p1 = scmp.lt.s32.totalorder %s848_s12, %s842_s9 }
 0x2ce   : > { %p844_p12 = pnand %p843_p11, %p981_p5  ;;  %p851_p2 = por %p850_p1, %p849_p0 }
 0x2d0   : > { %p845_p13 = pneg %p844_p12 }
 0x2d2   : > { %v426_v43 = vpop.xlane.xlu0 %425  ;;  %p852_p3 = pnand %p851_p2, %p845_p13 }
 0x2d3   : > { %v430_v44 = vsub.f32 %v421_v32, %v426_v43 }
 0x2d5   : > { %v432_v47 = vmul.f32 1.442695, %v430_v44 }
 0x345   : > { %v429_v45 = vpop.xlane.xlu1 %428 }
 0x346   : > { %v431_v46 = vsub.f32 %v422_v38, %v429_v45 }
 0x348   : > { %v434_v48 = vmul.f32 1.442695, %v431_v46 }
 0x349   : > { %v312_v49 = vpop.permute.xlu1 %311 }
 0x34a   : > { %834 = vpow2.f32 %v434_v48  ;;  %v315_v50 = vpack.c.bf16 %v312_v49, %v312_v49 }
 0x34b   : > { %836 = vpow2.f32 %v432_v47 }
 0x34c   : > { %v499_v51 = vsel %vm451_vm2, %v315_v50, 0 }
 0x34d   : > { %762 = vmatpush3.bf16.msra.mxu0 %v499_v51 }
 0x354   : > { %v835_v52 = vpop.eup %834 }
 0x355   : > { %v439_v53 = vsel %vm423_vm4, %v835_v52, 0.0  ;;  %v837_v54 = vpop.eup %836 }
 0x356   : > { %440 = vadd.xlane.f32.xlu0 %v439_v53  ;;  %v436_v55 = vsel %vm423_vm4, %v837_v54, 0.0 }
 0x35a   : > { %437 = vadd.xlane.f32.xlu0 %v436_v55 }
 0x3e3   : > { %v441_v56 = vpop.xlane.xlu0 %440 }
 0x3e4   : > { %838 = vrcp.f32 %v441_v56 }
 0x3e7   : > { %v438_v57 = vpop.xlane.xlu0 %437 }
 0x3e8   : > { %840 = vrcp.f32 %v438_v57 }
 0x3ee   : > { %v839_v58 = vpop.eup %838 }
 0x3ef   : > { %v445_v59 = vmul.f32 %v839_v58, %v835_v52 }
 0x3f1   : > { %v447_v60 = vpack.c.bf16 %v445_v59, %v445_v59 }
 0x3f2   : > { %v841_v61 = vpop.eup %840 }
 0x3f3   : > { %v444_v62 = vmul.f32 %v841_v61, %v837_v54  ;;  %764 = vmatmul.mubr.msk.bf16.vlgmr.msra.gmra.mrb[8].mxu0 %vm423_vm4, %v447_v60 }
 0x3f5   : > { %v446_v63 = vpack.c.bf16 %v444_v62, %v444_v62 }
 0x3f7   : > { %758 = vmatmul.mubr.msk.bf16.vlgmr.msra.gmra.mrb[4].mxu1 %vm423_vm4, %v446_v63 }
 0x3f8   : > { %775 = vmatprep.mubr.msk.bf16.mxu1 %vm908_vm1, %v907_v9  ;;  %768 = vmatpush3.bf16.msra.mxu1 %v830_v0 }
 0x3f9   : > { %769 = vmatprep.subr.bf16.mxu1 %v907_v9 }
 0x3fc   : > { %770 = vmatpush3.bf16.msra.mxu1 %v831_v1 }
 0x3fd   : > { %771 = vmatprep.subr.bf16.mxu1 %v907_v9 }
 0x400   : > { %772 = vmatpush3.bf16.msra.mxu1 %v832_v2 }
 0x401   : > { %773 = vmatprep.subr.bf16.mxu1 %v907_v9  ;;  %v720_v9 = vld [vmem:[%s1112_s4] ss:$0 sm:$0xff] }
 0x404   : > { %774 = vmatpush3.bf16.msra.mxu1 %v833_v3 }
 0x4c6   : > { %v535_v4 = vpop.f32.mrb[8].mxu0 }
 0x4c7   : > { %v542_v5 = vpack.c.bf16 %v535_v4, %v535_v4  ;;  %v765_v6 = vpop.f32.mrb[9].mxu0 }
 0x4c8   : > { %v538_v7 = vpop.f32.mrb[10].mxu0 }
 0x4c9   : > { %544 = vrot.lane.b32.xlu0 %v542_v5, %s911_s14  ;;  %v766_v8 = vpop.f32.mrb[11].mxu0 }
 0x4ca   : > { %v489_v10 = vpop.f32.mrb[4].mxu1 }
 0x4cb   : > { %v759_v11 = vpop.f32.mrb[5].mxu1  ;;  %v541_v14 = vpack.c.bf16 %v489_v10, %v489_v10 }
 0x4cc   : > { %v492_v12 = vpop.f32.mrb[6].mxu1 }
 0x4cd   : > { %v760_v13 = vpop.f32.mrb[7].mxu1 }
 0x53b   : > { %v545_v15 = vpop.permute.xlu0 %544 }
 0x53c   : > { %v548_v16 = vsel %vm259_vm0, %v541_v14, %v545_v15 }
 0x53d   : > { %776 = vmatmul.mubr.msk.bf16.vlgmr.msra.gmra.mrb[8].mxu1 %vm588_vm5, %v548_v16 }
 0x610   : > { %v625_v17 = vpop.f32.mrb[8].mxu1 }
 0x611   : > { %v626_v18 = vadd.f32 %v720_v9, %v625_v17  ;;  %v777_v19 = vpop.f32.mrb[9].mxu1 }
 0x612   : > { %v628_v20 = vpop.f32.mrb[10].mxu1 }
 0x613   : > { %v778_v21 = vpop.f32.mrb[11].mxu1  ;;  %631 = vst.msk [vmem:[%s215_s26] sm:$0xff] %vm259_vm0, %v626_v18 }
 0x614   : > { %855 = shalt.err (!%p852_p3)
}
 0x615   : > { %s856_s13 = scalar_lea.hbm %s1065_s8, 128  ;;  %s860_s16 = scalar_lea.hbm %s1113_s5, 256 }
 0x616   : > { %p857_p4 = scmp.ne.s32.totalorder %s1065_s8, %s856_s13  ;;  %p861_p9 = scmp.lt.u32.totalorder %s1065_s8, %s1113_s5 }
 0x617   : > { %p862_p10 = scmp.lt.u32.totalorder %s860_s16, %s856_s13  ;;  %p864_p12 = scmp.lt.u32.totalorder %s856_s13, %s1065_s8 }
 0x618   : > { %p858_p7 = pnand %p857_p4, %p981_p5 }
 0x619   : > { %p863_p11 = por %p862_p10, %p861_p9 }
 0x61a   : > { %p859_p8 = pneg %p858_p7 }
 0x61b   : > { %p865_p13 = por %p864_p12, %p863_p11 }
 0x61d   : > { %p866_p0 = pnand %p865_p13, %p859_p8 }
 0x61f   : > { %869 = shalt.err (!%p866_p0)
}
 0x620   : > { %779 = dma.vmem_to_hbm [thread:$0]  (%p981_p5), %s1067_s30, 128, %s1065_s8, %s633_s22  }
 0x621 PF: > { %p785_p1 = scmp.ge.s32.totalorder %s904_s21, 2  ;;  %s658_s25 = sand.u32 1, %s892_s18  }
 0x622   : > { %s659_s26 = scalar_lea.sflag [#allocation3], %s658_s25 }
 0x623   : > { %p782_p2 = pnand %p785_p1, %p985_p6 }
 0x625   : > { %887 = dma.done.wait (!%p782_p2), %s659_s26, 128  }
 0x626   : > { %889 = vsyncadd (!%p782_p2), %s659_s26, 4294967168  ;;  %p15_p3 = scmp.ge.s32.totalorder %s968_s24, 4   ;;  %s1116_s18 = smov %s896_s19 }
 0x627   : > { %s1117_s19 = smov %s900_s20  ;;  %s1118_s20 = smov %s979_s27 }
 0x628   : > { %s1119_s21 = smov %s968_s24  ;;  %17 = sbr.rel (!%p15_p3) target bundleno = 3 (0x3), region = 75 }
 0x62f   :  { %664 = vsyncpa [#allocation3], 1 }
 0x630   :  { %666 = vsyncpa [#allocation3 + $0x1], 1 }

</bundles_post_ra>
